<compile_context>
chip_gen: v7x
topology: tpu7x:2x2x1
jax: 0.10.0
libtpu: 0.0.40
codegen_flags: <defaults>
</compile_context>

<pallas_src>
import functools

import jax
import jax.numpy as jnp
from jax.experimental import pallas as pl
from jax.experimental.pallas import tpu as pltpu


def _round_up(v, m):
    return (v + m - 1) // m * m


def _moment_kernel(bi_ref, x_ref, out_ref, *, S, G_pad, N, TN, apply_abs,
                   mask_tail):
    # Grid: (feature tiles [parallel], node tiles [arbitrary/reduction]).
    n = pl.program_id(1)

    @pl.when(n == 0)
    def _():
        out_ref[...] = jnp.zeros_like(out_ref)

    x = x_ref[...].astype(jnp.float32)                     # (TN, TF), native -> f32
    base = jnp.abs(x) if apply_abs else x

    if mask_tail:
        # Last node tile is ragged: zero tail garbage BEFORE powering so it
        # cannot leak NaN/Inf through 0 * Inf in the matmul.
        node_pos = n * TN + jax.lax.broadcasted_iota(jnp.int32, base.shape, 0)
        base = jnp.where(node_pos < N, base, 0.0)

    bi = bi_ref[...]                                       # (1, TN) int32
    gids = jax.lax.broadcasted_iota(jnp.int32, (G_pad, TN), 0)
    # Exact 0/1 values -> bf16 cast is lossless.
    onehot = (gids == bi).astype(jnp.bfloat16)             # (G_pad, TN)
    # TODO(synk): for large num_graphs (hundreds+) the one-hot build + matmul
    # dominate; cache the one-hot per node tile instead of rebuilding it for
    # every feature tile.

    # out[s] += onehot @ base^(s+1): segment-sum on the MXU. Powers computed
    # in f32 on the VPU, operands cast to bf16 for a single-pass MXU matmul
    # with f32 accumulation (no Precision.HIGHEST emulation).
    p = base
    for s in range(S):                                     # S small & static
        out_ref[s] += jnp.dot(onehot, p.astype(jnp.bfloat16),
                              preferred_element_type=jnp.float32)
        if s + 1 < S:
            p = p * base


def graph_moment_aggregator(x, batch_index, num_graphs, S=4, apply_abs=True,
                            node_tile=2048):
    """x: (N, F), batch_index: (N,) int, num_graphs: static Python int.

    Returns (num_graphs, F, S) float32 (PyTorch layout)."""
    N, F = x.shape

    # bf16 sublane packing for the one-hot operand -> round graphs to 16.
    G_pad = _round_up(max(int(num_graphs), 1), 16)

    # Feature tile: multiple of 128 dividing F when possible (lane dense),
    # preferring >=2 tiles so the 'parallel' axis feeds both TCs on v7x.
    if F % 128 == 0:
        TF = None
        for cand in (512, 256, 128):
            if F % cand == 0 and F // cand >= 2:
                TF = cand
                break
        if TF is None:                      # e.g. F == 128: single feature tile
            for cand in (512, 256, 128):
                if F % cand == 0:
                    TF = cand
                    break
    else:
        # Full-extent feature block (allowed when equal to the array dim);
        # avoids any host-side pad/copy of x.
        TF = F
    # TODO(synk): when only one feature tile exists (small F), a core-parallel
    # split of the node axis would be needed to occupy both v7x TensorCores.

    # Node tile: keep each streamed x tile around <=4 MiB so double-buffered
    # input + f32 intermediates stay inside v5e / v7x scoped VMEM.
    itemsize = jnp.dtype(x.dtype).itemsize
    node_tile = min(node_tile, max(256, (4 * 1024 * 1024) // (TF * itemsize)))
    if N <= node_tile:
        TN = N                               # single, full-extent node tile
    else:
        TN = _round_up(node_tile, 128)
    num_node_tiles = -(-N // TN)
    N_pad = num_node_tiles * TN
    mask_tail = (N % TN) != 0

    # batch_index (tiny) is the only padded input; pad id -1 never matches.
    bi = jnp.pad(batch_index.astype(jnp.int32), (0, N_pad - N),
                 constant_values=-1).reshape(1, N_pad)

    kernel = functools.partial(_moment_kernel, S=S, G_pad=G_pad, N=N, TN=TN,
                               apply_abs=apply_abs, mask_tail=mask_tail)

    out_sgf = pl.pallas_call(
        kernel,
        out_shape=jax.ShapeDtypeStruct((S, G_pad, F), jnp.float32),
        grid_spec=pltpu.PrefetchScalarGridSpec(
            num_scalar_prefetch=0,
            grid=(F // TF, num_node_tiles),
            in_specs=[
                pl.BlockSpec((1, TN), lambda f, n: (0, n)),    # batch ids
                pl.BlockSpec((TN, TF), lambda f, n: (n, f)),   # x tile, native dtype
            ],
            # Same output block across the node axis -> resident accumulator.
            out_specs=pl.BlockSpec((S, G_pad, TF), lambda f, n: (0, 0, f)),
        ),
        compiler_params=pltpu.CompilerParams(
            dimension_semantics=("parallel", "arbitrary"),
            vmem_limit_bytes=64 << 20),
    )(bi, x)

    # (S, G_pad, F) -> drop graph padding -> PyTorch layout (G, F, S).
    return jnp.transpose(out_sgf[:, :num_graphs, :], (1, 2, 0))


def _reference(x, batch_index, num_graphs, S=4, apply_abs=True):
    base = jnp.abs(x) if apply_abs else x
    outs = []
    for g in range(num_graphs):
        mask = (batch_index == g)[:, None]
        rows = [jnp.sum(jnp.where(mask, base ** s, 0.0), axis=0)
                for s in range(1, S + 1)]
        outs.append(jnp.stack(rows, axis=-1))   # (F, S)
    return jnp.stack(outs, axis=0)              # (G, F, S)


if __name__ == "__main__":
    key = jax.random.PRNGKey(0)
    kx, kb = jax.random.split(key)

    num_nodes, num_features, S = 16, 32, 4
    num_graphs = 3

    x = jax.random.normal(kx, (num_nodes, num_features), dtype=jnp.float32)
    batch_index = jax.random.randint(kb, (num_nodes,), 0, num_graphs,
                                     dtype=jnp.int32)
    # guarantee every graph id appears at least once
    batch_index = batch_index.at[:num_graphs].set(
        jnp.arange(num_graphs, dtype=jnp.int32))

    out = graph_moment_aggregator(x, batch_index, num_graphs, S=S,
                                  apply_abs=True)
    out = jax.block_until_ready(out)

    ref = _reference(x, batch_index, num_graphs, S=S, apply_abs=True)
    assert out.shape == (num_graphs, num_features, S), out.shape
    # bf16 MXU operands (f32 accumulation) -> tolerance loosened accordingly.
    assert jnp.allclose(out, ref, atol=3e-2, rtol=3e-2), "mismatch vs reference"

    print("KERNEL_OK")
</pallas_src>

<mosaic_0001>
module attributes {stable_mosaic.version = 11 : i64} {
  func.func @_moment_kernel(%arg0: i32, %arg1: i32, %arg2: memref<1x16xi32, #tpu.memory_space<vmem>>, %arg3: memref<16x32xf32, #tpu.memory_space<vmem>>, %arg4: memref<4x16x32xf32, #tpu.memory_space<vmem>>) attributes {dimension_semantics = [#tpu.dimension_semantics<parallel>, #tpu.dimension_semantics<arbitrary>], iteration_bounds = array<i64: 1, 1>, scalar_prefetch = 0 : i64, scratch_operands = 0 : i64, tpu.core_type = #tpu.core_type<tc>, window_params = [{transform_indices = @transform_0, window_bounds = array<i64: 1, 16>}, {transform_indices = @transform_1, window_bounds = array<i64: 16, 32>}, {transform_indices = @transform_2, window_bounds = array<i64: 4, 16, 32>}]} {
    %c0_i32 = arith.constant 0 : i32
    %0 = arith.cmpi eq, %arg1, %c0_i32 : i32
    %1 = arith.extui %0 : i1 to i32
    %c0_i32_0 = arith.constant 0 : i32
    %2 = arith.cmpi ne, %1, %c0_i32_0 : i32
    scf.if %2 {
      %cst_28 = arith.constant 0.000000e+00 : f32
      %47 = vector.broadcast %cst_28 : f32 to vector<4x16x32xf32>
      %c0_29 = arith.constant 0 : index
      %c0_30 = arith.constant 0 : index
      %c0_31 = arith.constant 0 : index
      %48 = vector.load %arg4[%c0_29, %c0_30, %c0_31] : memref<4x16x32xf32, #tpu.memory_space<vmem>>, vector<4x16x32xf32>
      tpu.vector_store %arg4[%c0_29, %c0_30, %c0_31], %47 {strides = array<i32>} : memref<4x16x32xf32, #tpu.memory_space<vmem>>, vector<4x16x32xf32>,
    } else {
    }
    %c0 = arith.constant 0 : index
    %c0_1 = arith.constant 0 : index
    %3 = vector.load %arg3[%c0, %c0_1] : memref<16x32xf32, #tpu.memory_space<vmem>>, vector<16x32xf32>
    %4 = math.absf %3 : vector<16x32xf32>
    %c0_2 = arith.constant 0 : index
    %c0_3 = arith.constant 0 : index
    %5 = vector.load %arg2[%c0_2, %c0_3] : memref<1x16xi32, #tpu.memory_space<vmem>>, vector<1x16xi32>
    %6 = tpu.iota {dimensions = array<i32: 0>} : vector<16x16xi32>
    %7 = vector.broadcast %5 : vector<1x16xi32> to vector<16x16xi32>
    %8 = arith.cmpi eq, %6, %7 : vector<16x16xi32>
    %9 = arith.extui %8 : vector<16x16xi1> to vector<16x16xi32>
    %10 = arith.sitofp %9 : vector<16x16xi32> to vector<16x16xf32>
    %11 = arith.truncf %10 : vector<16x16xf32> to vector<16x16xbf16>
    %c0_4 = arith.constant 0 : index
    %c0_5 = arith.constant 0 : index
    %c0_6 = arith.constant 0 : index
    %12 = vector.load %arg4[%c0_4, %c0_5, %c0_6] : memref<4x16x32xf32, #tpu.memory_space<vmem>>, vector<1x16x32xf32>
    %13 = vector.shape_cast %12 : vector<1x16x32xf32> to vector<16x32xf32>
    %14 = arith.truncf %4 : vector<16x32xf32> to vector<16x32xbf16>
    %cst = arith.constant dense<0.000000e+00> : vector<16x32xf32>
    %15 = tpu.matmul %11, %14, %cst {dimension_numbers = #tpu.dot_dimension_numbers<[1], [0], [0], [1], [0, 0, 1, 1], [], []>} : vector<16x16xbf16>, vector<16x32xbf16>, vector<16x32xf32> -> vector<16x32xf32>
    %16 = arith.addf %13, %15 : vector<16x32xf32>
    %c0_7 = arith.constant 0 : index
    %c0_8 = arith.constant 0 : index
    %c0_9 = arith.constant 0 : index
    %17 = vector.load %arg4[%c0_7, %c0_8, %c0_9] : memref<4x16x32xf32, #tpu.memory_space<vmem>>, vector<1x16x32xf32>
    %18 = vector.shape_cast %17 : vector<1x16x32xf32> to vector<16x32xf32>
    %19 = vector.shape_cast %16 : vector<16x32xf32> to vector<1x16x32xf32>
    tpu.vector_store %arg4[%c0_7, %c0_8, %c0_9], %19 {strides = array<i32>} : memref<4x16x32xf32, #tpu.memory_space<vmem>>, vector<1x16x32xf32>,
    %20 = arith.mulf %4, %4 : vector<16x32xf32>
    %c1 = arith.constant 1 : index
    %c0_10 = arith.constant 0 : index
    %c0_11 = arith.constant 0 : index
    %21 = vector.load %arg4[%c1, %c0_10, %c0_11] : memref<4x16x32xf32, #tpu.memory_space<vmem>>, vector<1x16x32xf32>
    %22 = vector.shape_cast %21 : vector<1x16x32xf32> to vector<16x32xf32>
    %23 = arith.truncf %20 : vector<16x32xf32> to vector<16x32xbf16>
    %cst_12 = arith.constant dense<0.000000e+00> : vector<16x32xf32>
    %24 = tpu.matmul %11, %23, %cst_12 {dimension_numbers = #tpu.dot_dimension_numbers<[1], [0], [0], [1], [0, 0, 1, 1], [], []>} : vector<16x16xbf16>, vector<16x32xbf16>, vector<16x32xf32> -> vector<16x32xf32>
    %25 = arith.addf %22, %24 : vector<16x32xf32>
    %c1_13 = arith.constant 1 : index
    %c0_14 = arith.constant 0 : index
    %c0_15 = arith.constant 0 : index
    %26 = vector.load %arg4[%c1_13, %c0_14, %c0_15] : memref<4x16x32xf32, #tpu.memory_space<vmem>>, vector<1x16x32xf32>
    %27 = vector.shape_cast %26 : vector<1x16x32xf32> to vector<16x32xf32>
    %28 = vector.shape_cast %25 : vector<16x32xf32> to vector<1x16x32xf32>
    tpu.vector_store %arg4[%c1_13, %c0_14, %c0_15], %28 {strides = array<i32>} : memref<4x16x32xf32, #tpu.memory_space<vmem>>, vector<1x16x32xf32>,
    %29 = arith.mulf %20, %4 : vector<16x32xf32>
    %c2 = arith.constant 2 : index
    %c0_16 = arith.constant 0 : index
    %c0_17 = arith.constant 0 : index
    %30 = vector.load %arg4[%c2, %c0_16, %c0_17] : memref<4x16x32xf32, #tpu.memory_space<vmem>>, vector<1x16x32xf32>
    %31 = vector.shape_cast %30 : vector<1x16x32xf32> to vector<16x32xf32>
    %32 = arith.truncf %29 : vector<16x32xf32> to vector<16x32xbf16>
    %cst_18 = arith.constant dense<0.000000e+00> : vector<16x32xf32>
    %33 = tpu.matmul %11, %32, %cst_18 {dimension_numbers = #tpu.dot_dimension_numbers<[1], [0], [0], [1], [0, 0, 1, 1], [], []>} : vector<16x16xbf16>, vector<16x32xbf16>, vector<16x32xf32> -> vector<16x32xf32>
    %34 = arith.addf %31, %33 : vector<16x32xf32>
    %c2_19 = arith.constant 2 : index
    %c0_20 = arith.constant 0 : index
    %c0_21 = arith.constant 0 : index
    %35 = vector.load %arg4[%c2_19, %c0_20, %c0_21] : memref<4x16x32xf32, #tpu.memory_space<vmem>>, vector<1x16x32xf32>
    %36 = vector.shape_cast %35 : vector<1x16x32xf32> to vector<16x32xf32>
    %37 = vector.shape_cast %34 : vector<16x32xf32> to vector<1x16x32xf32>
    tpu.vector_store %arg4[%c2_19, %c0_20, %c0_21], %37 {strides = array<i32>} : memref<4x16x32xf32, #tpu.memory_space<vmem>>, vector<1x16x32xf32>,
    %38 = arith.mulf %29, %4 : vector<16x32xf32>
    %c3 = arith.constant 3 : index
    %c0_22 = arith.constant 0 : index
    %c0_23 = arith.constant 0 : index
    %39 = vector.load %arg4[%c3, %c0_22, %c0_23] : memref<4x16x32xf32, #tpu.memory_space<vmem>>, vector<1x16x32xf32>
    %40 = vector.shape_cast %39 : vector<1x16x32xf32> to vector<16x32xf32>
    %41 = arith.truncf %38 : vector<16x32xf32> to vector<16x32xbf16>
    %cst_24 = arith.constant dense<0.000000e+00> : vector<16x32xf32>
    %42 = tpu.matmul %11, %41, %cst_24 {dimension_numbers = #tpu.dot_dimension_numbers<[1], [0], [0], [1], [0, 0, 1, 1], [], []>} : vector<16x16xbf16>, vector<16x32xbf16>, vector<16x32xf32> -> vector<16x32xf32>
    %43 = arith.addf %40, %42 : vector<16x32xf32>
    %c3_25 = arith.constant 3 : index
    %c0_26 = arith.constant 0 : index
    %c0_27 = arith.constant 0 : index
    %44 = vector.load %arg4[%c3_25, %c0_26, %c0_27] : memref<4x16x32xf32, #tpu.memory_space<vmem>>, vector<1x16x32xf32>
    %45 = vector.shape_cast %44 : vector<1x16x32xf32> to vector<16x32xf32>
    %46 = vector.shape_cast %43 : vector<16x32xf32> to vector<1x16x32xf32>
    tpu.vector_store %arg4[%c3_25, %c0_26, %c0_27], %46 {strides = array<i32>} : memref<4x16x32xf32, #tpu.memory_space<vmem>>, vector<1x16x32xf32>,
    return
  }
  func.func @transform_0(%arg0: i32, %arg1: i32) -> (i32, i32) {
    %c0_i32 = arith.constant 0 : i32
    %c0_i32_0 = arith.constant 0 : i32
    return %c0_i32, %arg1 : i32, i32
  }
  func.func @transform_1(%arg0: i32, %arg1: i32) -> (i32, i32) {
    %c0_i32 = arith.constant 0 : i32
    return %arg1, %arg0 : i32, i32
  }
  func.func @transform_2(%arg0: i32, %arg1: i32) -> (i32, i32, i32) {
    %c0_i32 = arith.constant 0 : i32
    %c0_i32_0 = arith.constant 0 : i32
    %c0_i32_1 = arith.constant 0 : i32
    return %c0_i32, %c0_i32_0, %arg0 : i32, i32, i32
  }
}

</mosaic_0001>

<bundles_post_ra>
// kernel: tpu_custom_call.1
= control target key start
LH: loop header
LB: loop body
LE: loop exit
PB: predicated region body
PF: predicated region fallthrough
CT: control target
= control target key end

     0   :  { %7 = vsyncpa [#allocation3], 0  ;;  %s504_s0 = inlined_call_operand.hbm [shape: s32[1,16], index: 0, kind: input, shape index: {}]   ;;  %s505_s1 = inlined_call_operand.hbm [shape: f32[16,32], index: 1, kind: input, shape index: {}]   ;;  %s506_s2 = inlined_call_operand.hbm [shape: f32[4,16,32], index: 2, kind: output, shape index: {}]  }
   0x1   :  { %8 = vsyncpa [#allocation6], 0 }
   0x2   :  { %9 = vsyncpa [#allocation4], 0  ;;  %s413_s9 = smov [#allocation2]   ;;  %s414_s11 = smov [#allocation5]  }
   0x3   :  { %s16_s10 = sshll.u32 %s413_s9, 4  ;;  %s25_s12 = sshll.u32 %s414_s11, 4  ;;  %s17_s10 = int_to_ptr.vmem [resolvable:$true] %s16_s10  ;;  %s435_s12 = int_to_ptr.vmem [resolvable:$true] %s25_s12 }
   0x4   :  { %s341_s15 = scalar_lea.hbm %s504_s0, 16 }
   0x5   :  { %p342_p0 = scmp.ne.s32.totalorder %s504_s0, %s341_s15  ;;  %p345_p1 = scmp.lt.u32.totalorder %s341_s15, %s504_s0 }
   0x7   :  { %p347_p2 = pnand %p345_p1, %p342_p0 }
   0x9   :  { %350 = shalt.err (!%p347_p2)
}
   0xa   :  { %s351_s20 = scalar_lea.vmem %s17_s10, 16  ;;  %s355_s21 = scalar_lea.vmem %s17_s10, 32 }
   0xb   :  { %p352_p3 = scmp.ne.s32.totalorder %s17_s10, %s351_s20  ;;  %p356_p4 = scmp.lt.s32.totalorder %s17_s10, %s17_s10 }
   0xc   :  { %p357_p5 = scmp.lt.s32.totalorder %s355_s21, %s351_s20 }
   0xe   :  { %p358_p6 = por %p357_p5, %p356_p4 }
  0x10   :  { %p359_p7 = pnand %p358_p6, %p352_p3 }
  0x12   :  { %362 = shalt.err (!%p359_p7)
}
  0x13   :  { %19 = dma.hbm_to_vmem [thread:$0]  %s504_s0, 16, %s17_s10, [#allocation3]  }
  0x14   :  { %s363_s26 = scalar_lea.hbm %s505_s1, 256 }
  0x15   :  { %p364_p8 = scmp.ne.s32.totalorder %s505_s1, %s363_s26  ;;  %p367_p9 = scmp.lt.u32.totalorder %s363_s26, %s505_s1 }
  0x17   :  { %p369_p10 = pnand %p367_p9, %p364_p8 }
  0x19   :  { %372 = shalt.err (!%p369_p10)
}
  0x1a   :  { %s373_s3 = scalar_lea.vmem %s435_s12, 256  ;;  %p378_p12 = scmp.lt.s32.totalorder %s435_s12, %s435_s12 }
  0x1b   :  { %p374_p11 = scmp.ne.s32.totalorder %s435_s12, %s373_s3  ;;  %p379_p13 = scmp.lt.s32.totalorder %s373_s3, %s373_s3 }
  0x1d   :  { %p380_p0 = por %p379_p13, %p378_p12 }
  0x1f   :  { %p381_p1 = pnand %p380_p0, %p374_p11 }
  0x21   :  { %384 = shalt.err (!%p381_p1)
}
  0x22   :  { %s415_s0 = smov 128   ;;  %s416_s4 = smov 8  }
  0x23   :  { %31 = dma.hbm_to_vmem [thread:$0]  %s505_s1, 256, %s435_s12, [#allocation6], %s415_s0, %s415_s0, %s416_s4  }
  0x24   :  { %407 = dma.done.wait [#allocation3], 16  }
  0x25   :  { %408 = vsyncadd [#allocation3], 4294967280 }
  0x26   :  { %409 = dma.done.wait [#allocation6], 256  }
  0x27   :  { %410 = vsyncadd [#allocation6], 4294967040  ;;  %v57_v0 = vlaneseq  ;;  %v417_v1 = vmov 0.0   ;;  %vm43_vm0 = vcmask 261120   ;;  %vm418_vm1 = vmmov 0   ;;  %v52_v4 = vld [vmem:[#allocation5] sm:$0xff] }
  0x28   :  { %310 = vmatprep.subr.bf16.mxu0 %v417_v1  ;;  %316 = vmatprep.subr.bf16.mxu1 %v417_v1  ;;  %44 = vst.msk [vmem:[#allocation7] sm:$0xff] %vm43_vm0, %v417_v1  ;;  %45 = vst.msk [vmem:[#allocation7 + $0x8] sm:$0xff] %vm43_vm0, %v417_v1  ;;  %v53_v5 = vld [vmem:[#allocation5 + $0x8] sm:$0xff]  ;;  %v295_v6 = vld [vmem:[#allocation2] ss:$0 sm:$0xff]  ;;  %vm74_vm4 = vcmask 130048  }
  0x29   :  { %312 = vmatprep.mubr.msk.bf16.mxu0 %vm418_vm1, %v417_v1  ;;  %v58_v2 = vshrl.u32 %v57_v0, 7  ;;  %318 = vmatprep.mubr.msk.bf16.mxu1 %vm418_vm1, %v417_v1  ;;  %46 = vst.msk [vmem:[#allocation7 + $0x10] sm:$0xff] %vm43_vm0, %v417_v1  ;;  %47 = vst.msk [vmem:[#allocation7 + $0x18] sm:$0xff] %vm43_vm0, %v417_v1  ;;  %v54_v7 = vand.u32 2147483647, %v52_v4  ;;  %s419_s1 = smov [#allocation7]  }
  0x2a   :  { %48 = vst.msk [vmem:[#allocation7 + $0x20] sm:$0xff] %vm43_vm0, %v417_v1  ;;  %49 = vst.msk [vmem:[#allocation7 + $0x28] sm:$0xff] %vm43_vm0, %v417_v1  ;;  %v55_v8 = vand.u32 2147483647, %v53_v5  ;;  %s282_s7 = sshll.u32 %s419_s1, 4  ;;  %s283_s7 = int_to_ptr.vmem [resolvable:$true] %s282_s7 }
  0x2b   :  { %50 = vst.msk [vmem:[#allocation7 + $0x30] sm:$0xff] %vm43_vm0, %v417_v1  ;;  %51 = vst.msk [vmem:[#allocation7 + $0x38] sm:$0xff] %vm43_vm0, %v417_v1  ;;  %v59_v3 = vadd.s32 8, %v58_v2  ;;  %vm64_vm2 = vcmp.eq.s32.totalorder %v58_v2, %v295_v6  ;;  %v124_v12 = vmul.f32 %v54_v7, %v54_v7  ;;  %s385_s8 = scalar_lea.vmem %s283_s7, 1024  ;;  %p390_p3 = scmp.lt.s32.totalorder %s283_s7, %s283_s7 }
  0x2c   :  { %v296_v9 = vsel %vm64_vm2, 1.0, %v417_v1  ;;  %v73_v11 = vpack.c.bf16 %v55_v8, %v54_v7  ;;  %v125_v13 = vmul.f32 %v55_v8, %v55_v8  ;;  %p386_p2 = scmp.ne.s32.totalorder %s283_s7, %s385_s8  ;;  %p391_p4 = scmp.lt.s32.totalorder %s385_s8, %s385_s8 }
  0x2d   :  { %vm65_vm3 = vcmp.eq.s32.totalorder %v59_v3, %v295_v6  ;;  %v175_v16 = vmul.f32 %v124_v12, %v54_v7 }
  0x2e   :  { %v297_v10 = vsel %vm65_vm3, 1.0, %v417_v1  ;;  %311 = vmatpush3.bf16.msra.mxu0 %v73_v11  ;;  %v129_v15 = vpack.c.bf16 %v125_v13, %v124_v12  ;;  %v176_v17 = vmul.f32 %v125_v13, %v55_v8  ;;  %p392_p5 = por %p391_p4, %p390_p3 }
  0x2f   :  { %v70_v14 = vpack.c.bf16 %v297_v10, %v296_v9  ;;  %322 = vmatprep.subr.bf16.mxu0 %v417_v1  ;;  %v226_v18 = vmul.f32 %v175_v16, %v54_v7  ;;  %v71_v22 = vld [vmem:[#allocation7] sm:$0xff]  ;;  %v72_v24 = vld [vmem:[#allocation7 + $0x8] sm:$0xff] }
  0x30   :  { %317 = vmatpush3.bf16.msra.mxu1 %v129_v15  ;;  %v227_v19 = vmul.f32 %v176_v17, %v55_v8  ;;  %v180_v20 = vpack.c.bf16 %v176_v17, %v175_v16  ;;  %v127_v25 = vld [vmem:[#allocation7 + $0x10] sm:$0xff]  ;;  %v128_v30 = vld [vmem:[#allocation7 + $0x18] sm:$0xff]  ;;  %p393_p6 = pnand %p392_p5, %p386_p2 }
  0x31   :  { %313 = vmatmul.mubr.msk.bf16.vlgmr.msra.gmra.mrb[0].mxu0 %vm74_vm4, %v70_v14  ;;  %328 = vmatprep.subr.bf16.mxu1 %v417_v1  ;;  %v178_v38 = vld [vmem:[#allocation7 + $0x20] sm:$0xff]  ;;  %v179_v40 = vld [vmem:[#allocation7 + $0x28] sm:$0xff] }
  0x32   :  { %323 = vmatpush3.bf16.msra.mxu0 %v180_v20  ;;  %v231_v21 = vpack.c.bf16 %v227_v19, %v226_v18  ;;  %324 = vmatprep.mubr.msk.bf16.mxu0 %vm418_vm1, %v417_v1  ;;  %v229_v41 = vld [vmem:[#allocation7 + $0x30] sm:$0xff]  ;;  %v230_v46 = vld [vmem:[#allocation7 + $0x38] sm:$0xff] }
  0x33   :  { %319 = vmatmul.mubr.msk.bf16.vlgmr.msra.gmra.mrb[0].mxu1 %vm74_vm4, %v70_v14 }
  0x34   :  { %329 = vmatpush3.bf16.msra.mxu1 %v231_v21  ;;  %330 = vmatprep.mubr.msk.bf16.mxu1 %vm418_vm1, %v417_v1 }
  0x39   :  { %325 = vmatmul.mubr.msk.bf16.vlgmr.msra.gmra.mrb[4].mxu0 %vm74_vm4, %v70_v14 }
  0x3b   :  { %331 = vmatmul.mubr.msk.bf16.vlgmr.msra.gmra.mrb[4].mxu1 %vm74_vm4, %v70_v14 }
 0x104   :  { %v112_v23 = vpop.f32.mrb[0].mxu0 }
 0x105   :  { %v119_v26 = vadd.f32 %v112_v23, %v71_v22  ;;  %v314_v27 = vpop.f32.mrb[1].mxu0 }
 0x106   :  { %v115_v28 = vpop.f32.mrb[2].mxu0  ;;  %v164_v29 = vpop.f32.mrb[0].mxu1 }
 0x107   :  { %122 = vst.msk [vmem:[#allocation7] sm:$0xff] %vm43_vm0, %v119_v26  ;;  %v120_v31 = vadd.f32 %v115_v28, %v72_v24  ;;  %v171_v32 = vadd.f32 %v164_v29, %v127_v25  ;;  %v315_v33 = vpop.f32.mrb[3].mxu0  ;;  %v320_v34 = vpop.f32.mrb[1].mxu1 }
 0x108   :  { %v167_v35 = vpop.f32.mrb[2].mxu1 }
 0x109   :  { %123 = vst.msk [vmem:[#allocation7 + $0x8] sm:$0xff] %vm43_vm0, %v120_v31  ;;  %173 = vst.msk [vmem:[#allocation7 + $0x10] sm:$0xff] %vm43_vm0, %v171_v32  ;;  %v172_v36 = vadd.f32 %v167_v35, %v128_v30  ;;  %v321_v37 = vpop.f32.mrb[3].mxu1 }
 0x10b   :  { %174 = vst.msk [vmem:[#allocation7 + $0x18] sm:$0xff] %vm43_vm0, %v172_v36 }
 0x10c   :  { %v215_v39 = vpop.f32.mrb[4].mxu0 }
 0x10d   :  { %v222_v42 = vadd.f32 %v215_v39, %v178_v38  ;;  %v326_v43 = vpop.f32.mrb[5].mxu0 }
 0x10e   :  { %v218_v44 = vpop.f32.mrb[6].mxu0  ;;  %v266_v45 = vpop.f32.mrb[4].mxu1 }
 0x10f   :  { %224 = vst.msk [vmem:[#allocation7 + $0x20] sm:$0xff] %vm43_vm0, %v222_v42  ;;  %v223_v47 = vadd.f32 %v218_v44, %v179_v40  ;;  %v273_v48 = vadd.f32 %v266_v45, %v229_v41  ;;  %v327_v49 = vpop.f32.mrb[7].mxu0  ;;  %v332_v50 = vpop.f32.mrb[5].mxu1 }
 0x110   :  { %v269_v51 = vpop.f32.mrb[6].mxu1 }
 0x111   :  { %225 = vst.msk [vmem:[#allocation7 + $0x28] sm:$0xff] %vm43_vm0, %v223_v47  ;;  %275 = vst.msk [vmem:[#allocation7 + $0x30] sm:$0xff] %vm43_vm0, %v273_v48  ;;  %v274_v52 = vadd.f32 %v269_v51, %v230_v46  ;;  %v333_v53 = vpop.f32.mrb[7].mxu1 }
 0x113   :  { %276 = vst.msk [vmem:[#allocation7 + $0x38] sm:$0xff] %vm43_vm0, %v274_v52 }
 0x114   :  { %396 = shalt.err (!%p393_p6)
}
 0x115   :  { %s397_s11 = scalar_lea.hbm %s506_s2, 1024 }
 0x116   :  { %p398_p7 = scmp.ne.s32.totalorder %s506_s2, %s397_s11  ;;  %p401_p8 = scmp.lt.u32.totalorder %s397_s11, %s506_s2 }
 0x118   :  { %p403_p9 = pnand %p401_p8, %p398_p7 }
 0x11a   :  { %406 = shalt.err (!%p403_p9)
}
 0x11b   :  { %288 = dma.vmem_to_hbm [thread:$0]  %s283_s7, 1024, %s506_s2, [#allocation4], %s415_s0, %s415_s0, %s416_s4  }
 0x11c   :  { %411 = dma.done.wait [#allocation4], 1024  }
 0x11d   :  { %412 = vsyncadd [#allocation4], 4294966272 }
 0x11e   :  { %292 = vsyncpa [#allocation3], 1 }
 0x11f   :  { %293 = vsyncpa [#allocation6], 1 }
 0x120   :  { %294 = vsyncpa [#allocation4], 1 }

</bundles_post_ra>
